<compile_context>
chip_gen: v7x
topology: tpu7x:2x2x1
jax: 0.10.0
libtpu: 0.0.40
codegen_flags: <defaults>
</compile_context>

<pallas_src>
import functools
import math

import jax
import jax.numpy as jnp
import numpy as np
from jax import lax
from jax.experimental import pallas as pl
from jax.experimental.pallas import tpu as pltpu


def _layernorm(x, gamma, beta, eps=1e-5):
    # Matches torch.nn.LayerNorm (biased variance, eps inside sqrt), fp32.
    x = x.astype(jnp.float32)
    mu = jnp.mean(x, axis=-1, keepdims=True)
    var = jnp.mean((x - mu) ** 2, axis=-1, keepdims=True)
    return (x - mu) * lax.rsqrt(var + eps) * gamma + beta


def _decoder_layer_kernel(*refs, num_heads, b_tile, add_mask, compute_dtype):
    # ---- unpack refs (layout depends on static add_mask) ----
    idx = 0
    x_ref = refs[idx]; idx += 1          # (Mq, D),  Mq = b_tile*Lq
    y_ref = refs[idx]; idx += 1          # (Mkv, D), Mkv = b_tile*Lkv
    mask_ref = None
    if add_mask:
        mask_ref = refs[idx]; idx += 1   # (1, b_tile, 1, Lkv) float
    (wq_ref, bq_ref, wkv_ref, bkv_ref, wo_ref, bo_ref,
     w1_ref, b1_ref, w2_ref, b2_ref,
     g1_ref, be1_ref, g2_ref, be2_ref, g3_ref, be3_ref,
     out_ref, mix_ref) = refs[idx:]

    cd = compute_dtype
    H = num_heads
    x = x_ref[...]                        # (Mq, D)
    y = y_ref[...]                        # (Mkv, D)
    mq, _ = x.shape
    mkv = y.shape[0]
    lq = mq // b_tile
    lkv = mkv // b_tile
    qkv = wq_ref.shape[1]
    vp = wkv_ref.shape[1] - qkv
    cqk = qkv // H
    cv = vp // H

    # ---- pre-LN (fp32) ----
    xq = _layernorm(x, g1_ref[...], be1_ref[...]).astype(cd)   # norm1(x)
    yn = _layernorm(y, g3_ref[...], be3_ref[...]).astype(cd)   # norm3(y)

    # ---- fused full-width projections: two lane-dense MXU matmuls ----
    # (1/sqrt(Cqk) is folded into wq/bq in the wrapper; K and V share one dot.)
    q_all = jnp.dot(xq, wq_ref[...],
                    preferred_element_type=jnp.float32) + bq_ref[...]    # (Mq, QKV)
    kv_all = jnp.dot(yn, wkv_ref[...],
                     preferred_element_type=jnp.float32) + bkv_ref[...]  # (Mkv, QKV+VP)

    keep = None
    if add_mask:
        keep = mask_ref[0] > 0.0          # (b_tile, 1, Lkv) — broadcast over Lq

    # ---- per-head, batched (block-diagonal) attention ----
    # Scores are (b_tile, Lq, Lkv): no cross-batch waste, no bt^2 exp/select.
    # Each head's result is stored into the VMEM scratch at lane offset h*Cv,
    # which also bounds the per-head live ranges of the score/exp tensors.
    for h in range(H):
        qh = q_all[:, h * cqk:(h + 1) * cqk].reshape(b_tile, lq, cqk).astype(cd)
        kh = kv_all[:, h * cqk:(h + 1) * cqk].reshape(b_tile, lkv, cqk).astype(cd)
        vh = kv_all[:, qkv + h * cv: qkv + (h + 1) * cv].reshape(
            b_tile, lkv, cv).astype(cd)

        aff = lax.dot_general(qh, kh, (((2,), (2,)), ((0,), (0,))),
                              preferred_element_type=jnp.float32)  # (bt, Lq, Lkv)
        if keep is not None:
            aff = jnp.where(keep, aff, -jnp.inf)
        aff = aff - jnp.max(aff, axis=-1, keepdims=True)
        e = jnp.exp(aff)                                            # fp32
        rinv = pl.reciprocal(jnp.sum(e, axis=-1, keepdims=True),
                             approx=True)                           # EUP slot
        mix = lax.dot_general(e.astype(cd), vh, (((2,), (1,)), ((0,), (0,))),
                              preferred_element_type=jnp.float32) * rinv
        mix_ref[:, h * cv:(h + 1) * cv] = mix.reshape(mq, cv).astype(cd)

    # ---- one fused output projection over all heads (K = H*Cv) ----
    attn = jnp.dot(mix_ref[...], wo_ref[...],
                   preferred_element_type=jnp.float32) + bo_ref[...]
    x1 = x.astype(jnp.float32) + attn                               # residual 1

    # ---- MLP: fc1 -> QuickGELU -> (dropout p=0) -> fc2 ----
    xm = _layernorm(x1, g2_ref[...], be2_ref[...]).astype(cd)
    u = jnp.dot(xm, w1_ref[...], preferred_element_type=jnp.float32) + b1_ref[...]
    gelu = u * jax.nn.sigmoid(1.702 * u)                            # fp32
    m2 = jnp.dot(gelu.astype(cd), w2_ref[...],
                 preferred_element_type=jnp.float32) + b2_ref[...]

    out_ref[...] = (x1 + m2).astype(out_ref.dtype)                  # residual 2


def transformer_decoder_layer(x, y, mask, params, *, num_heads,
                              add_mask=False, batch_tile=None,
                              compute_dtype=jnp.bfloat16):
    """x: (N, Lq, D), y: (N, Lkv, D), mask: (N, Lkv) float (1 = keep).

    params are in (in, out) layout (transposed nn.Linear weights)."""
    N, Lq, D = x.shape
    _, Lkv, _ = y.shape
    (wq, bq, wk, bk, wv, bv, wo, bo,
     w1, b1, w2, b2,
     g1, be1, g2, be2, g3, be3) = params

    H = num_heads
    QKV = wq.shape[1]
    VP = wv.shape[1]
    Cqk = QKV // H
    MLP = w1.shape[1]

    # ---- batch_tile: fold batches into the matmul M dim.  Target ~256 folded
    # rows (amortize grid-step / MXU drain) but keep >= 2 grid tiles so both
    # v7x TensorCores get work; keep folded rows sublane-aligned. ----
    if batch_tile is None:
        cap = max(1, N // 2)
        target = max(1, min(256 // max(Lq, 1), cap))
        cands = [t for t in range(1, N + 1)
                 if N % t == 0 and (t == N or
                                    ((t * Lq) % 8 == 0 and (t * Lkv) % 8 == 0))]
        below = [t for t in cands if t <= target]
        batch_tile = max(below) if below else min(cands)
    assert N % batch_tile == 0
    num_tiles = N // batch_tile
    Mq = batch_tile * Lq
    Mkv = batch_tile * Lkv

    cd = compute_dtype
    scale = 1.0 / math.sqrt(Cqk)

    # ---- weight prep: fold softmax scale into Wq/bq, fuse K|V, cast matmul
    # operands to compute_dtype (bf16 storage halves resident weight VMEM). ----
    wq_s = (wq * scale).astype(cd)                       # (D, QKV)
    bq_s = (bq * scale).astype(jnp.float32)              # (1, QKV)
    wkv = jnp.concatenate([wk, wv], axis=1).astype(cd)   # (D, QKV+VP)
    bkv = jnp.concatenate([bk, bv], axis=1).astype(jnp.float32)
    wo_c = wo.astype(cd)                                 # (VP, D) original layout
    w1_c = w1.astype(cd)                                 # (D, MLP)
    w2_c = w2.astype(cd)                                 # (MLP, D)

    # ---- wrapper-side layout plumbing: fold batch into the row dimension ----
    x2 = x.reshape(N * Lq, D)
    y2 = y.reshape(N * Lkv, D)

    inputs = [x2, y2]
    in_specs = [
        pl.BlockSpec((Mq, D), lambda n: (n, 0)),
        pl.BlockSpec((Mkv, D), lambda n: (n, 0)),
    ]
    if add_mask:
        mask4 = mask.astype(jnp.float32).reshape(num_tiles, batch_tile, 1, Lkv)
        inputs.append(mask4)
        in_specs.append(
            pl.BlockSpec((1, batch_tile, 1, Lkv), lambda n: (n, 0, 0, 0)))

    weights = (wq_s, bq_s, wkv, bkv, wo_c, bo, w1_c, b1, w2_c, b2,
               g1, be1, g2, be2, g3, be3)

    def full_spec(a):
        # NOTE(v7x): at production sizes add pipeline_mode=pl.Buffered(1) here
        # (constant index_map) to avoid double-buffering the resident weights.
        nd = a.ndim
        return pl.BlockSpec(a.shape, lambda n, _nd=nd: (0,) * _nd)

    inputs += list(weights)
    in_specs += [full_spec(a) for a in weights]
    out_specs = pl.BlockSpec((Mq, D), lambda n: (n, 0))

    # ---- cost estimate + explicit VMEM budget ----
    def nbytes(a):
        return int(a.size) * a.dtype.itemsize

    flops = 2 * N * (Lq * D * QKV + Lkv * D * (QKV + VP)
                     + Lq * Lkv * QKV + Lq * Lkv * VP
                     + Lq * VP * D + 2 * Lq * D * MLP)
    transcendentals = N * (H * Lq * Lkv + Lq * MLP + H * Lq)
    bytes_accessed = (2 * nbytes(x2) + nbytes(y2)
                      + sum(nbytes(w) for w in weights)
                      + (N * Lkv * 4 if add_mask else 0))

    weight_bytes = sum(nbytes(w) for w in weights)
    tile_bytes = 4 * (2 * Mq * D + Mkv * D) + (batch_tile * Lkv * 4 if add_mask else 0)
    inter_bytes = (4 * (Mq * (QKV + VP + MLP) + 2 * batch_tile * Lq * Lkv)
                   + Mq * VP * jnp.dtype(cd).itemsize)
    vmem_limit = int(min(max(2 * (weight_bytes + tile_bytes) + inter_bytes + (4 << 20),
                             16 << 20),
                         64 << 20))      # cap = v7x physical VMEM per TensorCore

    kernel = functools.partial(
        _decoder_layer_kernel, num_heads=H, b_tile=batch_tile,
        add_mask=add_mask, compute_dtype=cd)

    out2 = pl.pallas_call(
        kernel,
        out_shape=jax.ShapeDtypeStruct((N * Lq, D), x.dtype),
        grid_spec=pltpu.PrefetchScalarGridSpec(
            num_scalar_prefetch=0,
            grid=(num_tiles,),
            in_specs=in_specs,
            out_specs=out_specs,
            scratch_shapes=[pltpu.VMEM((Mq, VP), cd)],   # per-head mix slab
        ),
        compiler_params=pltpu.CompilerParams(
            dimension_semantics=("parallel",),
            vmem_limit_bytes=vmem_limit),
        cost_estimate=pl.CostEstimate(flops=int(flops),
                                      transcendentals=int(transcendentals),
                                      bytes_accessed=int(bytes_accessed)),
    )(*inputs)
    return out2.reshape(N, Lq, D)


# ------------------------- reference (pure JAX) -------------------------
def reference_forward(x, y, mask, params, *, num_heads, add_mask=False):
    (wq, bq, wk, bk, wv, bv, wo, bo, w1, b1, w2, b2,
     g1, be1, g2, be2, g3, be3) = params
    if not add_mask:
        mask = jnp.ones_like(mask)

    def ln(t, g, b):
        mu = jnp.mean(t, -1, keepdims=True)
        var = jnp.mean((t - mu) ** 2, -1, keepdims=True)
        return (t - mu) * lax.rsqrt(var + 1e-5) * g + b

    yn = ln(y, g3, be3)
    q = ln(x, g1, be1) @ wq + bq
    k = yn @ wk + bk
    v = yn @ wv + bv
    N, Lq, _ = q.shape
    Lkv = k.shape[1]
    H = num_heads
    q = q.reshape(N, Lq, H, -1)
    k = k.reshape(N, Lkv, H, -1)
    v = v.reshape(N, Lkv, H, -1)
    Cqk = q.shape[-1]
    aff = jnp.einsum("nqhc,nkhc->nqkh", q / np.sqrt(Cqk), k)
    rmask = mask <= 0
    aff = jnp.where(rmask[:, None, :, None], -jnp.inf, aff)
    aff = jax.nn.softmax(aff, axis=-2)
    mix = jnp.einsum("nqlh,nlhc->nqhc", aff, v).reshape(N, Lq, -1)
    x1 = x + (mix @ wo + bo)
    u = ln(x1, g2, be2) @ w1 + b1
    gelu = u * jax.nn.sigmoid(1.702 * u)
    return x1 + (gelu @ w2 + b2)


# ------------------------------- main ------------------------------------
if __name__ == "__main__":
    N, Lq, Lkv = 2, 8, 8
    D = 32            # in_feature_dim
    QKV = 32          # qkv_dim
    H = 4             # num_heads
    MLP = int(round(4.0 * D))

    key = jax.random.PRNGKey(0)
    ks = jax.random.split(key, 12)

    def xavier(k, fan_in, fan_out):
        lim = float(np.sqrt(6.0 / (fan_in + fan_out)))
        return jax.random.uniform(k, (fan_in, fan_out), jnp.float32, -lim, lim)

    # weights stored (in, out) = transposed nn.Linear layout
    wq = xavier(ks[0], D, QKV); bq = jnp.zeros((1, QKV), jnp.float32)
    wk = xavier(ks[1], D, QKV); bk = jnp.zeros((1, QKV), jnp.float32)
    wv = xavier(ks[2], D, QKV); bv = jnp.zeros((1, QKV), jnp.float32)
    wo = xavier(ks[3], QKV, D); bo = jnp.zeros((1, D), jnp.float32)
    w1 = xavier(ks[4], D, MLP); b1 = jax.random.normal(ks[5], (1, MLP), jnp.float32) * 1e-6
    w2 = xavier(ks[6], MLP, D); b2 = jax.random.normal(ks[7], (1, D), jnp.float32) * 1e-6
    g1 = jnp.ones((1, D), jnp.float32); be1 = jnp.zeros((1, D), jnp.float32)
    g2 = jnp.ones((1, D), jnp.float32); be2 = jnp.zeros((1, D), jnp.float32)
    g3 = jnp.ones((1, D), jnp.float32); be3 = jnp.zeros((1, D), jnp.float32)

    params = (wq, bq, wk, bk, wv, bv, wo, bo, w1, b1, w2, b2,
              g1, be1, g2, be2, g3, be3)

    x = jax.random.normal(ks[8], (N, Lq, D), jnp.float32)
    y = jax.random.normal(ks[9], (N, Lkv, D), jnp.float32)
    mask = jnp.ones((N, Lkv), jnp.float32)

    ref = reference_forward(x, y, mask, params, num_heads=H, add_mask=False)

    # --- fp32 matmul operands, unmasked (module default add_mask=False) ---
    out_fp32 = transformer_decoder_layer(x, y, mask, params, num_heads=H,
                                         add_mask=False,
                                         compute_dtype=jnp.float32)
    out_fp32 = jax.block_until_ready(out_fp32)
    # tolerance accounts for the approximate EUP reciprocal in softmax
    np.testing.assert_allclose(np.asarray(out_fp32), np.asarray(ref),
                               rtol=5e-3, atol=5e-3)

    # --- masked path (add_mask=True), fp32 ---
    mask2 = (jax.random.uniform(ks[10], (N, Lkv)) > 0.4).astype(jnp.float32)
    mask2 = mask2.at[:, 0].set(1.0)   # keep >=1 key/row (avoid all -inf rows)
    ref_m = reference_forward(x, y, mask2, params, num_heads=H, add_mask=True)
    out_m = transformer_decoder_layer(x, y, mask2, params, num_heads=H,
                                      add_mask=True, compute_dtype=jnp.float32)
    out_m = jax.block_until_ready(out_m)
    np.testing.assert_allclose(np.asarray(out_m), np.asarray(ref_m),
                               rtol=5e-3, atol=5e-3)

    # --- masked path with batch_tile=2 (exercises batched block-diagonal scores) ---
    out_m2 = transformer_decoder_layer(x, y, mask2, params, num_heads=H,
                                       add_mask=True, batch_tile=2,
                                       compute_dtype=jnp.float32)
    out_m2 = jax.block_until_ready(out_m2)
    np.testing.assert_allclose(np.asarray(out_m2), np.asarray(ref_m),
                               rtol=5e-3, atol=5e-3)

    # --- default bf16 matmul-operand path (recommended on v5e/v6e/v7x) ---
    out_bf = transformer_decoder_layer(x, y, mask, params, num_heads=H,
                                       add_mask=False)
    out_bf = jax.block_until_ready(out_bf)
    np.testing.assert_allclose(np.asarray(out_bf), np.asarray(ref),
                               rtol=5e-2, atol=5e-2)

    print("KERNEL_OK")
</pallas_src>

<mosaic_0001>
module attributes {stable_mosaic.version = 11 : i64} {
  func.func @_decoder_layer_kernel(%arg0: i32, %arg1: memref<8x32xf32, #tpu.memory_space<vmem>>, %arg2: memref<8x32xf32, #tpu.memory_space<vmem>>, %arg3: memref<32x32xf32, #tpu.memory_space<vmem>>, %arg4: memref<1x32xf32, #tpu.memory_space<vmem>>, %arg5: memref<32x64xf32, #tpu.memory_space<vmem>>, %arg6: memref<1x64xf32, #tpu.memory_space<vmem>>, %arg7: memref<32x32xf32, #tpu.memory_space<vmem>>, %arg8: memref<1x32xf32, #tpu.memory_space<vmem>>, %arg9: memref<32x128xf32, #tpu.memory_space<vmem>>, %arg10: memref<1x128xf32, #tpu.memory_space<vmem>>, %arg11: memref<128x32xf32, #tpu.memory_space<vmem>>, %arg12: memref<1x32xf32, #tpu.memory_space<vmem>>, %arg13: memref<1x32xf32, #tpu.memory_space<vmem>>, %arg14: memref<1x32xf32, #tpu.memory_space<vmem>>, %arg15: memref<1x32xf32, #tpu.memory_space<vmem>>, %arg16: memref<1x32xf32, #tpu.memory_space<vmem>>, %arg17: memref<1x32xf32, #tpu.memory_space<vmem>>, %arg18: memref<1x32xf32, #tpu.memory_space<vmem>>, %arg19: memref<8x32xf32, #tpu.memory_space<vmem>>, %arg20: memref<8x32xf32, #tpu.memory_space<vmem>>) attributes {dimension_semantics = [#tpu.dimension_semantics<parallel>], iteration_bounds = array<i64: 2>, scalar_prefetch = 0 : i64, scratch_operands = 1 : i64, tpu.core_type = #tpu.core_type<tc>, window_params = [{transform_indices = @transform_0, window_bounds = array<i64: 8, 32>}, {transform_indices = @transform_1, window_bounds = array<i64: 8, 32>}, {pipeline_mode = #tpu.pipeline_mode<synchronous>, transform_indices = @transform_2, window_bounds = array<i64: 32, 32>}, {pipeline_mode = #tpu.pipeline_mode<synchronous>, transform_indices = @transform_3, window_bounds = array<i64: 1, 32>}, {pipeline_mode = #tpu.pipeline_mode<synchronous>, transform_indices = @transform_4, window_bounds = array<i64: 32, 64>}, {pipeline_mode = #tpu.pipeline_mode<synchronous>, transform_indices = @transform_5, window_bounds = array<i64: 1, 64>}, {pipeline_mode = #tpu.pipeline_mode<synchronous>, transform_indices = @transform_6, window_bounds = array<i64: 32, 32>}, {pipeline_mode = #tpu.pipeline_mode<synchronous>, transform_indices = @transform_7, window_bounds = array<i64: 1, 32>}, {pipeline_mode = #tpu.pipeline_mode<synchronous>, transform_indices = @transform_8, window_bounds = array<i64: 32, 128>}, {pipeline_mode = #tpu.pipeline_mode<synchronous>, transform_indices = @transform_9, window_bounds = array<i64: 1, 128>}, {pipeline_mode = #tpu.pipeline_mode<synchronous>, transform_indices = @transform_10, window_bounds = array<i64: 128, 32>}, {pipeline_mode = #tpu.pipeline_mode<synchronous>, transform_indices = @transform_11, window_bounds = array<i64: 1, 32>}, {pipeline_mode = #tpu.pipeline_mode<synchronous>, transform_indices = @transform_12, window_bounds = array<i64: 1, 32>}, {pipeline_mode = #tpu.pipeline_mode<synchronous>, transform_indices = @transform_13, window_bounds = array<i64: 1, 32>}, {pipeline_mode = #tpu.pipeline_mode<synchronous>, transform_indices = @transform_14, window_bounds = array<i64: 1, 32>}, {pipeline_mode = #tpu.pipeline_mode<synchronous>, transform_indices = @transform_15, window_bounds = array<i64: 1, 32>}, {pipeline_mode = #tpu.pipeline_mode<synchronous>, transform_indices = @transform_16, window_bounds = array<i64: 1, 32>}, {pipeline_mode = #tpu.pipeline_mode<synchronous>, transform_indices = @transform_17, window_bounds = array<i64: 1, 32>}, {transform_indices = @transform_18, window_bounds = array<i64: 8, 32>}]} {
    %c0 = arith.constant 0 : index
    %c0_0 = arith.constant 0 : index
    %0 = vector.load %arg1[%c0, %c0_0] : memref<8x32xf32, #tpu.memory_space<vmem>>, vector<8x32xf32>
    %c0_1 = arith.constant 0 : index
    %c0_2 = arith.constant 0 : index
    %1 = vector.load %arg2[%c0_1, %c0_2] : memref<8x32xf32, #tpu.memory_space<vmem>>, vector<8x32xf32>
    %c0_3 = arith.constant 0 : index
    %c0_4 = arith.constant 0 : index
    %2 = vector.load %arg13[%c0_3, %c0_4] : memref<1x32xf32, #tpu.memory_space<vmem>>, vector<1x32xf32>
    %c0_5 = arith.constant 0 : index
    %c0_6 = arith.constant 0 : index
    %3 = vector.load %arg14[%c0_5, %c0_6] : memref<1x32xf32, #tpu.memory_space<vmem>>, vector<1x32xf32>
    %cst = arith.constant dense<0.000000e+00> : vector<8xf32>
    %4 = vector.multi_reduction <add>, %0, %cst [1] : vector<8x32xf32> to vector<8xf32>
    %5 = vector.shape_cast %4 : vector<8xf32> to vector<8x1xf32>
    %cst_7 = arith.constant 3.200000e+01 : f32
    %6 = vector.broadcast %cst_7 : f32 to vector<8x1xf32>
    %7 = arith.divf %5, %6 : vector<8x1xf32>
    %8 = vector.broadcast %7 : vector<8x1xf32> to vector<8x32xf32>
    %9 = arith.subf %0, %8 : vector<8x32xf32>
    %10 = arith.mulf %9, %9 : vector<8x32xf32>
    %cst_8 = arith.constant dense<0.000000e+00> : vector<8xf32>
    %11 = vector.multi_reduction <add>, %10, %cst_8 [1] : vector<8x32xf32> to vector<8xf32>
    %12 = vector.shape_cast %11 : vector<8xf32> to vector<8x1xf32>
    %cst_9 = arith.constant 3.200000e+01 : f32
    %13 = vector.broadcast %cst_9 : f32 to vector<8x1xf32>
    %14 = arith.divf %12, %13 : vector<8x1xf32>
    %15 = vector.broadcast %7 : vector<8x1xf32> to vector<8x32xf32>
    %16 = arith.subf %0, %15 : vector<8x32xf32>
    %cst_10 = arith.constant 9.99999974E-6 : f32
    %17 = vector.broadcast %cst_10 : f32 to vector<8x1xf32>
    %18 = arith.addf %14, %17 : vector<8x1xf32>
    %19 = math.rsqrt %18 : vector<8x1xf32>
    %20 = vector.broadcast %19 : vector<8x1xf32> to vector<8x32xf32>
    %21 = arith.mulf %16, %20 : vector<8x32xf32>
    %22 = vector.broadcast %2 : vector<1x32xf32> to vector<8x32xf32>
    %23 = arith.mulf %21, %22 : vector<8x32xf32>
    %24 = vector.broadcast %3 : vector<1x32xf32> to vector<8x32xf32>
    %25 = arith.addf %23, %24 : vector<8x32xf32>
    %c0_11 = arith.constant 0 : index
    %c0_12 = arith.constant 0 : index
    %26 = vector.load %arg17[%c0_11, %c0_12] : memref<1x32xf32, #tpu.memory_space<vmem>>, vector<1x32xf32>
    %c0_13 = arith.constant 0 : index
    %c0_14 = arith.constant 0 : index
    %27 = vector.load %arg18[%c0_13, %c0_14] : memref<1x32xf32, #tpu.memory_space<vmem>>, vector<1x32xf32>
    %cst_15 = arith.constant dense<0.000000e+00> : vector<8xf32>
    %28 = vector.multi_reduction <add>, %1, %cst_15 [1] : vector<8x32xf32> to vector<8xf32>
    %29 = vector.shape_cast %28 : vector<8xf32> to vector<8x1xf32>
    %cst_16 = arith.constant 3.200000e+01 : f32
    %30 = vector.broadcast %cst_16 : f32 to vector<8x1xf32>
    %31 = arith.divf %29, %30 : vector<8x1xf32>
    %32 = vector.broadcast %31 : vector<8x1xf32> to vector<8x32xf32>
    %33 = arith.subf %1, %32 : vector<8x32xf32>
    %34 = arith.mulf %33, %33 : vector<8x32xf32>
    %cst_17 = arith.constant dense<0.000000e+00> : vector<8xf32>
    %35 = vector.multi_reduction <add>, %34, %cst_17 [1] : vector<8x32xf32> to vector<8xf32>
    %36 = vector.shape_cast %35 : vector<8xf32> to vector<8x1xf32>
    %cst_18 = arith.constant 3.200000e+01 : f32
    %37 = vector.broadcast %cst_18 : f32 to vector<8x1xf32>
    %38 = arith.divf %36, %37 : vector<8x1xf32>
    %39 = vector.broadcast %31 : vector<8x1xf32> to vector<8x32xf32>
    %40 = arith.subf %1, %39 : vector<8x32xf32>
    %cst_19 = arith.constant 9.99999974E-6 : f32
    %41 = vector.broadcast %cst_19 : f32 to vector<8x1xf32>
    %42 = arith.addf %38, %41 : vector<8x1xf32>
    %43 = math.rsqrt %42 : vector<8x1xf32>
    %44 = vector.broadcast %43 : vector<8x1xf32> to vector<8x32xf32>
    %45 = arith.mulf %40, %44 : vector<8x32xf32>
    %46 = vector.broadcast %26 : vector<1x32xf32> to vector<8x32xf32>
    %47 = arith.mulf %45, %46 : vector<8x32xf32>
    %48 = vector.broadcast %27 : vector<1x32xf32> to vector<8x32xf32>
    %49 = arith.addf %47, %48 : vector<8x32xf32>
    %c0_20 = arith.constant 0 : index
    %c0_21 = arith.constant 0 : index
    %50 = vector.load %arg3[%c0_20, %c0_21] : memref<32x32xf32, #tpu.memory_space<vmem>>, vector<32x32xf32>
    %cst_22 = arith.constant dense<0.000000e+00> : vector<8x32xf32>
    %51 = tpu.matmul %25, %50, %cst_22 {dimension_numbers = #tpu.dot_dimension_numbers<[1], [0], [0], [1], [0, 0, 1, 1], [], []>} : vector<8x32xf32>, vector<32x32xf32>, vector<8x32xf32> -> vector<8x32xf32>
    %c0_23 = arith.constant 0 : index
    %c0_24 = arith.constant 0 : index
    %52 = vector.load %arg4[%c0_23, %c0_24] : memref<1x32xf32, #tpu.memory_space<vmem>>, vector<1x32xf32>
    %53 = vector.broadcast %52 : vector<1x32xf32> to vector<8x32xf32>
    %54 = arith.addf %51, %53 : vector<8x32xf32>
    %c0_25 = arith.constant 0 : index
    %c0_26 = arith.constant 0 : index
    %55 = vector.load %arg5[%c0_25, %c0_26] : memref<32x64xf32, #tpu.memory_space<vmem>>, vector<32x64xf32>
    %cst_27 = arith.constant dense<0.000000e+00> : vector<8x64xf32>
    %56 = tpu.matmul %49, %55, %cst_27 {dimension_numbers = #tpu.dot_dimension_numbers<[1], [0], [0], [1], [0, 0, 1, 1], [], []>} : vector<8x32xf32>, vector<32x64xf32>, vector<8x64xf32> -> vector<8x64xf32>
    %c0_28 = arith.constant 0 : index
    %c0_29 = arith.constant 0 : index
    %57 = vector.load %arg6[%c0_28, %c0_29] : memref<1x64xf32, #tpu.memory_space<vmem>>, vector<1x64xf32>
    %58 = vector.broadcast %57 : vector<1x64xf32> to vector<8x64xf32>
    %59 = arith.addf %56, %58 : vector<8x64xf32>
    %60 = vector.extract_strided_slice %54 {offsets = [0, 0], sizes = [8, 8], strides = [1, 1]} : vector<8x32xf32> to vector<8x8xf32>
    %61 = vector.shape_cast %60 : vector<8x8xf32> to vector<1x8x8xf32>
    %62 = vector.extract_strided_slice %59 {offsets = [0, 0], sizes = [8, 8], strides = [1, 1]} : vector<8x64xf32> to vector<8x8xf32>
    %63 = vector.shape_cast %62 : vector<8x8xf32> to vector<1x8x8xf32>
    %64 = vector.extract_strided_slice %59 {offsets = [0, 32], sizes = [8, 8], strides = [1, 1]} : vector<8x64xf32> to vector<8x8xf32>
    %65 = vector.shape_cast %64 : vector<8x8xf32> to vector<1x8x8xf32>
    %cst_30 = arith.constant dense<0.000000e+00> : vector<1x8x8xf32>
    %66 = tpu.matmul %61, %63, %cst_30 {dimension_numbers = #tpu.dot_dimension_numbers<[2], [2], [1], [1], [0, 0, 0, 1, 1, 1], [0], [0]>} : vector<1x8x8xf32>, vector<1x8x8xf32>, vector<1x8x8xf32> -> vector<1x8x8xf32>
    %cst_31 = arith.constant dense<0xFF800000> : vector<1x8xf32>
    %67 = vector.multi_reduction <maximumf>, %66, %cst_31 [2] : vector<1x8x8xf32> to vector<1x8xf32>
    %68 = vector.shape_cast %67 : vector<1x8xf32> to vector<1x8x1xf32>
    %69 = vector.broadcast %68 : vector<1x8x1xf32> to vector<1x8x8xf32>
    %70 = arith.subf %66, %69 : vector<1x8x8xf32>
    %71 = math.exp %70 : vector<1x8x8xf32>
    %cst_32 = arith.constant dense<0.000000e+00> : vector<1x8xf32>
    %72 = vector.multi_reduction <add>, %71, %cst_32 [2] : vector<1x8x8xf32> to vector<1x8xf32>
    %73 = vector.shape_cast %72 : vector<1x8xf32> to vector<1x8x1xf32>
    %74 = tpu.reciprocal %73 {approx = true} : vector<1x8x1xf32> -> vector<1x8x1xf32>
    %cst_33 = arith.constant dense<0.000000e+00> : vector<1x8x8xf32>
    %75 = tpu.matmul %71, %65, %cst_33 {dimension_numbers = #tpu.dot_dimension_numbers<[2], [1], [1], [2], [0, 0, 0, 1, 1, 2], [0], [0]>} : vector<1x8x8xf32>, vector<1x8x8xf32>, vector<1x8x8xf32> -> vector<1x8x8xf32>
    %76 = vector.broadcast %74 : vector<1x8x1xf32> to vector<1x8x8xf32>
    %77 = arith.mulf %75, %76 : vector<1x8x8xf32>
    %78 = vector.shape_cast %77 : vector<1x8x8xf32> to vector<8x8xf32>
    %c0_34 = arith.constant 0 : index
    %c0_35 = arith.constant 0 : index
    %79 = vector.load %arg20[%c0_34, %c0_35] : memref<8x32xf32, #tpu.memory_space<vmem>>, vector<8x8xf32>
    tpu.vector_store %arg20[%c0_34, %c0_35], %78 {strides = array<i32>} : memref<8x32xf32, #tpu.memory_space<vmem>>, vector<8x8xf32>,
    %80 = vector.extract_strided_slice %54 {offsets = [0, 8], sizes = [8, 8], strides = [1, 1]} : vector<8x32xf32> to vector<8x8xf32>
    %81 = vector.shape_cast %80 : vector<8x8xf32> to vector<1x8x8xf32>
    %82 = vector.extract_strided_slice %59 {offsets = [0, 8], sizes = [8, 8], strides = [1, 1]} : vector<8x64xf32> to vector<8x8xf32>
    %83 = vector.shape_cast %82 : vector<8x8xf32> to vector<1x8x8xf32>
    %84 = vector.extract_strided_slice %59 {offsets = [0, 40], sizes = [8, 8], strides = [1, 1]} : vector<8x64xf32> to vector<8x8xf32>
    %85 = vector.shape_cast %84 : vector<8x8xf32> to vector<1x8x8xf32>
    %cst_36 = arith.constant dense<0.000000e+00> : vector<1x8x8xf32>
    %86 = tpu.matmul %81, %83, %cst_36 {dimension_numbers = #tpu.dot_dimension_numbers<[2], [2], [1], [1], [0, 0, 0, 1, 1, 1], [0], [0]>} : vector<1x8x8xf32>, vector<1x8x8xf32>, vector<1x8x8xf32> -> vector<1x8x8xf32>
    %cst_37 = arith.constant dense<0xFF800000> : vector<1x8xf32>
    %87 = vector.multi_reduction <maximumf>, %86, %cst_37 [2] : vector<1x8x8xf32> to vector<1x8xf32>
    %88 = vector.shape_cast %87 : vector<1x8xf32> to vector<1x8x1xf32>
    %89 = vector.broadcast %88 : vector<1x8x1xf32> to vector<1x8x8xf32>
    %90 = arith.subf %86, %89 : vector<1x8x8xf32>
    %91 = math.exp %90 : vector<1x8x8xf32>
    %cst_38 = arith.constant dense<0.000000e+00> : vector<1x8xf32>
    %92 = vector.multi_reduction <add>, %91, %cst_38 [2] : vector<1x8x8xf32> to vector<1x8xf32>
    %93 = vector.shape_cast %92 : vector<1x8xf32> to vector<1x8x1xf32>
    %94 = tpu.reciprocal %93 {approx = true} : vector<1x8x1xf32> -> vector<1x8x1xf32>
    %cst_39 = arith.constant dense<0.000000e+00> : vector<1x8x8xf32>
    %95 = tpu.matmul %91, %85, %cst_39 {dimension_numbers = #tpu.dot_dimension_numbers<[2], [1], [1], [2], [0, 0, 0, 1, 1, 2], [0], [0]>} : vector<1x8x8xf32>, vector<1x8x8xf32>, vector<1x8x8xf32> -> vector<1x8x8xf32>
    %96 = vector.broadcast %94 : vector<1x8x1xf32> to vector<1x8x8xf32>
    %97 = arith.mulf %95, %96 : vector<1x8x8xf32>
    %98 = vector.shape_cast %97 : vector<1x8x8xf32> to vector<8x8xf32>
    %c0_40 = arith.constant 0 : index
    %c8 = arith.constant 8 : index
    %99 = vector.load %arg20[%c0_40, %c8] : memref<8x32xf32, #tpu.memory_space<vmem>>, vector<8x8xf32>
    tpu.vector_store %arg20[%c0_40, %c8], %98 {strides = array<i32>} : memref<8x32xf32, #tpu.memory_space<vmem>>, vector<8x8xf32>,
    %100 = vector.extract_strided_slice %54 {offsets = [0, 16], sizes = [8, 8], strides = [1, 1]} : vector<8x32xf32> to vector<8x8xf32>
    %101 = vector.shape_cast %100 : vector<8x8xf32> to vector<1x8x8xf32>
    %102 = vector.extract_strided_slice %59 {offsets = [0, 16], sizes = [8, 8], strides = [1, 1]} : vector<8x64xf32> to vector<8x8xf32>
    %103 = vector.shape_cast %102 : vector<8x8xf32> to vector<1x8x8xf32>
    %104 = vector.extract_strided_slice %59 {offsets = [0, 48], sizes = [8, 8], strides = [1, 1]} : vector<8x64xf32> to vector<8x8xf32>
    %105 = vector.shape_cast %104 : vector<8x8xf32> to vector<1x8x8xf32>
    %cst_41 = arith.constant dense<0.000000e+00> : vector<1x8x8xf32>
    %106 = tpu.matmul %101, %103, %cst_41 {dimension_numbers = #tpu.dot_dimension_numbers<[2], [2], [1], [1], [0, 0, 0, 1, 1, 1], [0], [0]>} : vector<1x8x8xf32>, vector<1x8x8xf32>, vector<1x8x8xf32> -> vector<1x8x8xf32>
    %cst_42 = arith.constant dense<0xFF800000> : vector<1x8xf32>
    %107 = vector.multi_reduction <maximumf>, %106, %cst_42 [2] : vector<1x8x8xf32> to vector<1x8xf32>
    %108 = vector.shape_cast %107 : vector<1x8xf32> to vector<1x8x1xf32>
    %109 = vector.broadcast %108 : vector<1x8x1xf32> to vector<1x8x8xf32>
    %110 = arith.subf %106, %109 : vector<1x8x8xf32>
    %111 = math.exp %110 : vector<1x8x8xf32>
    %cst_43 = arith.constant dense<0.000000e+00> : vector<1x8xf32>
    %112 = vector.multi_reduction <add>, %111, %cst_43 [2] : vector<1x8x8xf32> to vector<1x8xf32>
    %113 = vector.shape_cast %112 : vector<1x8xf32> to vector<1x8x1xf32>
    %114 = tpu.reciprocal %113 {approx = true} : vector<1x8x1xf32> -> vector<1x8x1xf32>
    %cst_44 = arith.constant dense<0.000000e+00> : vector<1x8x8xf32>
    %115 = tpu.matmul %111, %105, %cst_44 {dimension_numbers = #tpu.dot_dimension_numbers<[2], [1], [1], [2], [0, 0, 0, 1, 1, 2], [0], [0]>} : vector<1x8x8xf32>, vector<1x8x8xf32>, vector<1x8x8xf32> -> vector<1x8x8xf32>
    %116 = vector.broadcast %114 : vector<1x8x1xf32> to vector<1x8x8xf32>
    %117 = arith.mulf %115, %116 : vector<1x8x8xf32>
    %118 = vector.shape_cast %117 : vector<1x8x8xf32> to vector<8x8xf32>
    %c0_45 = arith.constant 0 : index
    %c16 = arith.constant 16 : index
    %119 = vector.load %arg20[%c0_45, %c16] : memref<8x32xf32, #tpu.memory_space<vmem>>, vector<8x8xf32>
    tpu.vector_store %arg20[%c0_45, %c16], %118 {strides = array<i32>} : memref<8x32xf32, #tpu.memory_space<vmem>>, vector<8x8xf32>,
    %120 = vector.extract_strided_slice %54 {offsets = [0, 24], sizes = [8, 8], strides = [1, 1]} : vector<8x32xf32> to vector<8x8xf32>
    %121 = vector.shape_cast %120 : vector<8x8xf32> to vector<1x8x8xf32>
    %122 = vector.extract_strided_slice %59 {offsets = [0, 24], sizes = [8, 8], strides = [1, 1]} : vector<8x64xf32> to vector<8x8xf32>
    %123 = vector.shape_cast %122 : vector<8x8xf32> to vector<1x8x8xf32>
    %124 = vector.extract_strided_slice %59 {offsets = [0, 56], sizes = [8, 8], strides = [1, 1]} : vector<8x64xf32> to vector<8x8xf32>
    %125 = vector.shape_cast %124 : vector<8x8xf32> to vector<1x8x8xf32>
    %cst_46 = arith.constant dense<0.000000e+00> : vector<1x8x8xf32>
    %126 = tpu.matmul %121, %123, %cst_46 {dimension_numbers = #tpu.dot_dimension_numbers<[2], [2], [1], [1], [0, 0, 0, 1, 1, 1], [0], [0]>} : vector<1x8x8xf32>, vector<1x8x8xf32>, vector<1x8x8xf32> -> vector<1x8x8xf32>
    %cst_47 = arith.constant dense<0xFF800000> : vector<1x8xf32>
    %127 = vector.multi_reduction <maximumf>, %126, %cst_47 [2] : vector<1x8x8xf32> to vector<1x8xf32>
    %128 = vector.shape_cast %127 : vector<1x8xf32> to vector<1x8x1xf32>
    %129 = vector.broadcast %128 : vector<1x8x1xf32> to vector<1x8x8xf32>
    %130 = arith.subf %126, %129 : vector<1x8x8xf32>
    %131 = math.exp %130 : vector<1x8x8xf32>
    %cst_48 = arith.constant dense<0.000000e+00> : vector<1x8xf32>
    %132 = vector.multi_reduction <add>, %131, %cst_48 [2] : vector<1x8x8xf32> to vector<1x8xf32>
    %133 = vector.shape_cast %132 : vector<1x8xf32> to vector<1x8x1xf32>
    %134 = tpu.reciprocal %133 {approx = true} : vector<1x8x1xf32> -> vector<1x8x1xf32>
    %cst_49 = arith.constant dense<0.000000e+00> : vector<1x8x8xf32>
    %135 = tpu.matmul %131, %125, %cst_49 {dimension_numbers = #tpu.dot_dimension_numbers<[2], [1], [1], [2], [0, 0, 0, 1, 1, 2], [0], [0]>} : vector<1x8x8xf32>, vector<1x8x8xf32>, vector<1x8x8xf32> -> vector<1x8x8xf32>
    %136 = vector.broadcast %134 : vector<1x8x1xf32> to vector<1x8x8xf32>
    %137 = arith.mulf %135, %136 : vector<1x8x8xf32>
    %138 = vector.shape_cast %137 : vector<1x8x8xf32> to vector<8x8xf32>
    %c0_50 = arith.constant 0 : index
    %c24 = arith.constant 24 : index
    %139 = vector.load %arg20[%c0_50, %c24] : memref<8x32xf32, #tpu.memory_space<vmem>>, vector<8x8xf32>
    tpu.vector_store %arg20[%c0_50, %c24], %138 {strides = array<i32>} : memref<8x32xf32, #tpu.memory_space<vmem>>, vector<8x8xf32>,
    %c0_51 = arith.constant 0 : index
    %c0_52 = arith.constant 0 : index
    %140 = vector.load %arg20[%c0_51, %c0_52] : memref<8x32xf32, #tpu.memory_space<vmem>>, vector<8x32xf32>
    %c0_53 = arith.constant 0 : index
    %c0_54 = arith.constant 0 : index
    %141 = vector.load %arg7[%c0_53, %c0_54] : memref<32x32xf32, #tpu.memory_space<vmem>>, vector<32x32xf32>
    %cst_55 = arith.constant dense<0.000000e+00> : vector<8x32xf32>
    %142 = tpu.matmul %140, %141, %cst_55 {dimension_numbers = #tpu.dot_dimension_numbers<[1], [0], [0], [1], [0, 0, 1, 1], [], []>} : vector<8x32xf32>, vector<32x32xf32>, vector<8x32xf32> -> vector<8x32xf32>
    %c0_56 = arith.constant 0 : index
    %c0_57 = arith.constant 0 : index
    %143 = vector.load %arg8[%c0_56, %c0_57] : memref<1x32xf32, #tpu.memory_space<vmem>>, vector<1x32xf32>
    %144 = vector.broadcast %143 : vector<1x32xf32> to vector<8x32xf32>
    %145 = arith.addf %142, %144 : vector<8x32xf32>
    %146 = arith.addf %0, %145 : vector<8x32xf32>
    %c0_58 = arith.constant 0 : index
    %c0_59 = arith.constant 0 : index
    %147 = vector.load %arg15[%c0_58, %c0_59] : memref<1x32xf32, #tpu.memory_space<vmem>>, vector<1x32xf32>
    %c0_60 = arith.constant 0 : index
    %c0_61 = arith.constant 0 : index
    %148 = vector.load %arg16[%c0_60, %c0_61] : memref<1x32xf32, #tpu.memory_space<vmem>>, vector<1x32xf32>
    %cst_62 = arith.constant dense<0.000000e+00> : vector<8xf32>
    %149 = vector.multi_reduction <add>, %146, %cst_62 [1] : vector<8x32xf32> to vector<8xf32>
    %150 = vector.shape_cast %149 : vector<8xf32> to vector<8x1xf32>
    %cst_63 = arith.constant 3.200000e+01 : f32
    %151 = vector.broadcast %cst_63 : f32 to vector<8x1xf32>
    %152 = arith.divf %150, %151 : vector<8x1xf32>
    %153 = vector.broadcast %152 : vector<8x1xf32> to vector<8x32xf32>
    %154 = arith.subf %146, %153 : vector<8x32xf32>
    %155 = arith.mulf %154, %154 : vector<8x32xf32>
    %cst_64 = arith.constant dense<0.000000e+00> : vector<8xf32>
    %156 = vector.multi_reduction <add>, %155, %cst_64 [1] : vector<8x32xf32> to vector<8xf32>
    %157 = vector.shape_cast %156 : vector<8xf32> to vector<8x1xf32>
    %cst_65 = arith.constant 3.200000e+01 : f32
    %158 = vector.broadcast %cst_65 : f32 to vector<8x1xf32>
    %159 = arith.divf %157, %158 : vector<8x1xf32>
    %160 = vector.broadcast %152 : vector<8x1xf32> to vector<8x32xf32>
    %161 = arith.subf %146, %160 : vector<8x32xf32>
    %cst_66 = arith.constant 9.99999974E-6 : f32
    %162 = vector.broadcast %cst_66 : f32 to vector<8x1xf32>
    %163 = arith.addf %159, %162 : vector<8x1xf32>
    %164 = math.rsqrt %163 : vector<8x1xf32>
    %165 = vector.broadcast %164 : vector<8x1xf32> to vector<8x32xf32>
    %166 = arith.mulf %161, %165 : vector<8x32xf32>
    %167 = vector.broadcast %147 : vector<1x32xf32> to vector<8x32xf32>
    %168 = arith.mulf %166, %167 : vector<8x32xf32>
    %169 = vector.broadcast %148 : vector<1x32xf32> to vector<8x32xf32>
    %170 = arith.addf %168, %169 : vector<8x32xf32>
    %c0_67 = arith.constant 0 : index
    %c0_68 = arith.constant 0 : index
    %171 = vector.load %arg9[%c0_67, %c0_68] : memref<32x128xf32, #tpu.memory_space<vmem>>, vector<32x128xf32>
    %cst_69 = arith.constant dense<0.000000e+00> : vector<8x128xf32>
    %172 = tpu.matmul %170, %171, %cst_69 {dimension_numbers = #tpu.dot_dimension_numbers<[1], [0], [0], [1], [0, 0, 1, 1], [], []>} : vector<8x32xf32>, vector<32x128xf32>, vector<8x128xf32> -> vector<8x128xf32>
    %c0_70 = arith.constant 0 : index
    %c0_71 = arith.constant 0 : index
    %173 = vector.load %arg10[%c0_70, %c0_71] : memref<1x128xf32, #tpu.memory_space<vmem>>, vector<1x128xf32>
    %174 = vector.broadcast %173 : vector<1x128xf32> to vector<8x128xf32>
    %175 = arith.addf %172, %174 : vector<8x128xf32>
    %cst_72 = arith.constant 1.702000e+00 : f32
    %176 = vector.broadcast %cst_72 : f32 to vector<8x128xf32>
    %177 = arith.mulf %176, %175 : vector<8x128xf32>
    %178 = arith.negf %177 : vector<8x128xf32>
    %179 = math.exp %178 : vector<8x128xf32>
    %cst_73 = arith.constant 1.000000e+00 : f32
    %180 = vector.broadcast %cst_73 : f32 to vector<8x128xf32>
    %181 = arith.addf %180, %179 : vector<8x128xf32>
    %182 = arith.divf %180, %181 : vector<8x128xf32>
    %183 = arith.mulf %175, %182 : vector<8x128xf32>
    %c0_74 = arith.constant 0 : index
    %c0_75 = arith.constant 0 : index
    %184 = vector.load %arg11[%c0_74, %c0_75] : memref<128x32xf32, #tpu.memory_space<vmem>>, vector<128x32xf32>
    %cst_76 = arith.constant dense<0.000000e+00> : vector<8x32xf32>
    %185 = tpu.matmul %183, %184, %cst_76 {dimension_numbers = #tpu.dot_dimension_numbers<[1], [0], [0], [1], [0, 0, 1, 1], [], []>} : vector<8x128xf32>, vector<128x32xf32>, vector<8x32xf32> -> vector<8x32xf32>
    %c0_77 = arith.constant 0 : index
    %c0_78 = arith.constant 0 : index
    %186 = vector.load %arg12[%c0_77, %c0_78] : memref<1x32xf32, #tpu.memory_space<vmem>>, vector<1x32xf32>
    %187 = vector.broadcast %186 : vector<1x32xf32> to vector<8x32xf32>
    %188 = arith.addf %185, %187 : vector<8x32xf32>
    %189 = arith.addf %146, %188 : vector<8x32xf32>
    %c0_79 = arith.constant 0 : index
    %c0_80 = arith.constant 0 : index
    %190 = vector.load %arg19[%c0_79, %c0_80] : memref<8x32xf32, #tpu.memory_space<vmem>>, vector<8x32xf32>
    tpu.vector_store %arg19[%c0_79, %c0_80], %189 {strides = array<i32>} : memref<8x32xf32, #tpu.memory_space<vmem>>, vector<8x32xf32>,
    return
  }
  func.func @transform_0(%arg0: i32) -> (i32, i32) {
    %c0_i32 = arith.constant 0 : i32
    %c0_i32_0 = arith.constant 0 : i32
    return %arg0, %c0_i32 : i32, i32
  }
  func.func @transform_1(%arg0: i32) -> (i32, i32) {
    %c0_i32 = arith.constant 0 : i32
    %c0_i32_0 = arith.constant 0 : i32
    return %arg0, %c0_i32 : i32, i32
  }
  func.func @transform_2(%arg0: i32) -> (i32, i32) {
    %c0_i32 = arith.constant 0 : i32
    %c0_i32_0 = arith.constant 0 : i32
    %c0_i32_1 = arith.constant 0 : i32
    return %c0_i32, %c0_i32_0 : i32, i32
  }
  func.func @transform_3(%arg0: i32) -> (i32, i32) {
    %c0_i32 = arith.constant 0 : i32
    %c0_i32_0 = arith.constant 0 : i32
    %c0_i32_1 = arith.constant 0 : i32
    return %c0_i32, %c0_i32_0 : i32, i32
  }
  func.func @transform_4(%arg0: i32) -> (i32, i32) {
    %c0_i32 = arith.constant 0 : i32
    %c0_i32_0 = arith.constant 0 : i32
    %c0_i32_1 = arith.constant 0 : i32
    return %c0_i32, %c0_i32_0 : i32, i32
  }
  func.func @transform_5(%arg0: i32) -> (i32, i32) {
    %c0_i32 = arith.constant 0 : i32
    %c0_i32_0 = arith.constant 0 : i32
    %c0_i32_1 = arith.constant 0 : i32
    return %c0_i32, %c0_i32_0 : i32, i32
  }
  func.func @transform_6(%arg0: i32) -> (i32, i32) {
    %c0_i32 = arith.constant 0 : i32
    %c0_i32_0 = arith.constant 0 : i32
    %c0_i32_1 = arith.constant 0 : i32
    return %c0_i32, %c0_i32_0 : i32, i32
  }
  func.func @transform_7(%arg0: i32) -> (i32, i32) {
    %c0_i32 = arith.constant 0 : i32
    %c0_i32_0 = arith.constant 0 : i32
    %c0_i32_1 = arith.constant 0 : i32
    return %c0_i32, %c0_i32_0 : i32, i32
  }
  func.func @transform_8(%arg0: i32) -> (i32, i32) {
    %c0_i32 = arith.constant 0 : i32
    %c0_i32_0 = arith.constant 0 : i32
    %c0_i32_1 = arith.constant 0 : i32
    return %c0_i32, %c0_i32_0 : i32, i32
  }
  func.func @transform_9(%arg0: i32) -> (i32, i32) {
    %c0_i32 = arith.constant 0 : i32
    %c0_i32_0 = arith.constant 0 : i32
    %c0_i32_1 = arith.constant 0 : i32
    return %c0_i32, %c0_i32_0 : i32, i32
  }
  func.func @transform_10(%arg0: i32) -> (i32, i32) {
    %c0_i32 = arith.constant 0 : i32
    %c0_i32_0 = arith.constant 0 : i32
    %c0_i32_1 = arith.constant 0 : i32
    return %c0_i32, %c0_i32_0 : i32, i32
  }
  func.func @transform_11(%arg0: i32) -> (i32, i32) {
    %c0_i32 = arith.constant 0 : i32
    %c0_i32_0 = arith.constant 0 : i32
    %c0_i32_1 = arith.constant 0 : i32
    return %c0_i32, %c0_i32_0 : i32, i32
  }
  func.func @transform_12(%arg0: i32) -> (i32, i32) {
    %c0_i32 = arith.constant 0 : i32
    %c0_i32_0 = arith.constant 0 : i32
    %c0_i32_1 = arith.constant 0 : i32
    return %c0_i32, %c0_i32_0 : i32, i32
  }
  func.func @transform_13(%arg0: i32) -> (i32, i32) {
    %c0_i32 = arith.constant 0 : i32
    %c0_i32_0 = arith.constant 0 : i32
    %c0_i32_1 = arith.constant 0 : i32
    return %c0_i32, %c0_i32_0 : i32, i32
  }
  func.func @transform_14(%arg0: i32) -> (i32, i32) {
    %c0_i32 = arith.constant 0 : i32
    %c0_i32_0 = arith.constant 0 : i32
    %c0_i32_1 = arith.constant 0 : i32
    return %c0_i32, %c0_i32_0 : i32, i32
  }
  func.func @transform_15(%arg0: i32) -> (i32, i32) {
    %c0_i32 = arith.constant 0 : i32
    %c0_i32_0 = arith.constant 0 : i32
    %c0_i32_1 = arith.constant 0 : i32
    return %c0_i32, %c0_i32_0 : i32, i32
  }
  func.func @transform_16(%arg0: i32) -> (i32, i32) {
    %c0_i32 = arith.constant 0 : i32
    %c0_i32_0 = arith.constant 0 : i32
    %c0_i32_1 = arith.constant 0 : i32
    return %c0_i32, %c0_i32_0 : i32, i32
  }
  func.func @transform_17(%arg0: i32) -> (i32, i32) {
    %c0_i32 = arith.constant 0 : i32
    %c0_i32_0 = arith.constant 0 : i32
    %c0_i32_1 = arith.constant 0 : i32
    return %c0_i32, %c0_i32_0 : i32, i32
  }
  func.func @transform_18(%arg0: i32) -> (i32, i32) {
    %c0_i32 = arith.constant 0 : i32
    %c0_i32_0 = arith.constant 0 : i32
    return %arg0, %c0_i32 : i32, i32
  }
}

</mosaic_0001>

<bundles_post_ra>
// kernel: tpu_custom_call.1
= control target key start
LH: loop header
LB: loop body
LE: loop exit
PB: predicated region body
PF: predicated region fallthrough
CT: control target
= control target key end

     0   :  { %s2717_s0 = inlined_call_operand.vmem [shape: f32[16,32], index: 0, kind: input, shape index: {}]   ;;  %s2718_s1 = inlined_call_operand.vmem [shape: f32[16,32], index: 1, kind: input, shape index: {}]   ;;  %s2719_s2 = inlined_call_operand.vmem [shape: f32[32,32], index: 2, kind: input, shape index: {}]   ;;  %s2720_s3 = inlined_call_operand.vmem [shape: f32[1,32], index: 3, kind: input, shape index: {}]   ;;  %s2721_s4 = inlined_call_operand.vmem [shape: f32[32,64], index: 4, kind: input, shape index: {}]   ;;  %s2722_s5 = inlined_call_operand.vmem [shape: f32[1,64], index: 5, kind: input, shape index: {}]   ;;  %s2723_s6 = inlined_call_operand.vmem [shape: f32[32,32], index: 6, kind: input, shape index: {}]   ;;  %s2724_s7 = inlined_call_operand.vmem [shape: f32[1,32], index: 7, kind: input, shape index: {}]   ;;  %s2725_s8 = inlined_call_operand.vmem [shape: f32[32,128], index: 8, kind: input, shape index: {}]   ;;  %s2726_s9 = inlined_call_operand.vmem [shape: f32[1,128], index: 9, kind: input, shape index: {}]   ;;  %s2727_s10 = inlined_call_operand.vmem [shape: f32[128,32], index: 10, kind: input, shape index: {}]   ;;  %s2728_s11 = inlined_call_operand.vmem [shape: f32[1,32], index: 11, kind: input, shape index: {}]   ;;  %s2729_s12 = inlined_call_operand.vmem [shape: f32[1,32], index: 12, kind: input, shape index: {}]   ;;  %s2730_s13 = inlined_call_operand.vmem [shape: f32[1,32], index: 13, kind: input, shape index: {}]   ;;  %s2731_s14 = inlined_call_operand.vmem [shape: f32[1,32], index: 14, kind: input, shape index: {}]   ;;  %s2732_s15 = inlined_call_operand.vmem [shape: f32[1,32], index: 15, kind: input, shape index: {}]   ;;  %s2733_s16 = inlined_call_operand.vmem [shape: f32[1,32], index: 16, kind: input, shape index: {}]   ;;  %s2734_s17 = inlined_call_operand.vmem [shape: f32[1,32], index: 17, kind: input, shape index: {}]   ;;  %s2735_s18 = inlined_call_operand.hbm [shape: f32[16,32], index: 18, kind: output, shape index: {}]  }
   0x1   :  { %2742 = sst [smem:[#allocation10_spill]] %s2717_s0 }
   0x2   :  { %2743 = sst [smem:[#allocation11_spill]] %s2718_s1 }
   0x3   :  { %2744 = sst [smem:[#allocation12_spill]] %s2719_s2 }
   0x4   :  { %2745 = sst [smem:[#allocation13_spill]] %s2720_s3 }
   0x5   :  { %23 = vsyncpa [#allocation4], 0 }
   0x6   :  { %25 = vsyncpa [#allocation4 + $0x1], 0  ;;  %s2393_s27 = smov 0   ;;  %s2395_s28 = smov 0  }
   0x7   :  { %s2397_s29 = smov 0   ;;  %s2399_s30 = smov 0  }
   0x8 LB: > { %2746 = sst [smem:[#allocation6_spill]] %s2270_s27  ;;  %s2414_s0 = sadd.s32 4294967295, %s2282_s30   ;;  %s2282_s30 = sphi %s2399_s30, %s2757_s30   ;;  %s2278_s29 = sphi %s2397_s29, %s2759_s29   ;;  %s2274_s28 = sphi %s2395_s28, %s2761_s28   ;;  %s2270_s27 = sphi %s2393_s27, %s2760_s27  }
   0x9   : > { %2747 = sst [smem:[#allocation7_spill]] %s2278_s29  ;;  %s1883_s19 = sadd.s32 4294967294, %s2282_s30  }
   0xa   : > { %s2418_s1 = sadd.s32 1, %s2282_s30   ;;  %s426_s20 = sadd.s32 1, %s2278_s29 }
   0xb   : > { %2748 = sst [smem:[#allocation8_spill]] %s2418_s1  ;;  %s423_s21 = ssub.s32 %s2282_s30, %s2418_s1 }
   0xc   : > { %p436_p0 = scmp.ne.s32.totalorder %s2278_s29, %s2274_s28  ;;  %p424_p1 = scmp.eq.s32.totalorder %s423_s21, 0 }
   0xd   : > { %p437_p2 = scmp.eq.s32.totalorder %s2414_s0, 1  ;;  %p442_p3 = scmp.ne.s32.totalorder %s2274_s28, %s2270_s27 }
   0xe   : > { %p443_p4 = scmp.eq.s32.totalorder %s1883_s19, 1  ;;  %p1886_p7 = scmp.ge.s32.totalorder %s2282_s30, 1 }
   0xf   : > { %s2429_s22 = scalar_select %p424_p1, %s2278_s29, %s426_s20  }
  0x10   : > { %p2431_p5 = por %p437_p2, %p436_p0  ;;  %p2435_p6 = por %p443_p4, %p442_p3 }
  0x11   : > { %2749 = sst [smem:[#allocation9_spill]] %s2429_s22  ;;  %p523_p8 = scmp.lt.s32.totalorder %s2282_s30, 3 }
  0x13   : > { %p524_p9 = pnand %p1886_p7, %p523_p8 }
  0x14   : > { %p580_p10 = scmp.lt.s32.totalorder (!%p524_p9), %s2414_s0, 1  ;;  %vm592_vm0 = vcmask (!%p524_p9), 261120   ;;  %s2752_s20 = sld [smem:[#allocation10_spill]] (!%p524_p9)  ;;  %v2284_v17 = vmov (!%p524_p9), 0.0|0.0   ;;  %vm2285_vm1 = vmmov (!%p524_p9), 0   ;;  %v2286_v21 = vmov (!%p524_p9), 0.0  }
  0x15   : > { %527 = sbr.rel (%p524_p9) target bundleno = 2406 (0x966), region = 92  ;;  %s2753_s1 = sld [smem:[#allocation11_spill]] (!%p524_p9)  ;;  %2094 = vmatprep.subr.bf16.mxu1 (!%p524_p9), %v2284_v17  ;;  %1983 = vmatprep.mubr.msk.f32.mxu1 (!%p524_p9), %vm2285_vm1, %v2286_v21  ;;  %v1890_v29 = vld [vmem:[%s2729_s12] ss:$0 sm:$0xff] (!%p524_p9)  ;;  %v735_v32 = vld [vmem:[%s2721_s4 + $0x8] sm:$0xff] (!%p524_p9)  ;;  %v736_v39 = vld [vmem:[%s2721_s4 + $0x10] sm:$0xff] (!%p524_p9) }
  0x16   : > { %1997 = vmatprep.subr.mxu0 (!%p524_p9), %v2286_v21  ;;  %1999 = vmatprep.mubr.msk.f32.mxu0 (!%p524_p9), %vm2285_vm1, %v2286_v21  ;;  %v734_v31 = vld [vmem:[%s2721_s4] sm:$0xff] (!%p524_p9)  ;;  %v737_v40 = vld [vmem:[%s2721_s4 + $0x18] sm:$0xff] (!%p524_p9)  ;;  %s2755_s3 = sld [smem:[#allocation13_spill]] (!%p524_p9)  ;;  %vm818_vm2 = vcmask (!%p524_p9), 64512   ;;  %s2288_s22 = smov (!%p524_p9), 112   ;;  %vm1152_vm3 = vcmask (!%p524_p9), 130112  }
  0x17   : > { %v1891_v33 = vld [vmem:[%s2730_s13] ss:$0 sm:$0xff] (!%p524_p9)  ;;  %v2101_v36 = vpack.c.bf16 (!%p524_p9), %v735_v32, %v734_v31  ;;  %v2104_v42 = vpack.c.bf16 (!%p524_p9), %v737_v40, %v736_v39  ;;  %s2291_s26 = smov (!%p524_p9), 80   ;;  %s2292_s19 = smov (!%p524_p9), 72   ;;  %vm1323_vm4 = vcmask (!%p524_p9), 195712   ;;  %vm1494_vm5 = vcmask (!%p524_p9), 261312  }
  0x18   : > { %v1892_v41 = vld [vmem:[%s2733_s16] ss:$0 sm:$0xff] (!%p524_p9) }
  0x19   : > { %v1893_v44 = vld [vmem:[%s2734_s17] ss:$0 sm:$0xff] (!%p524_p9) }
  0x1a   : > { %v1896_v50 = vld [vmem:[%s2722_s5] ss:$0 sm:$0xff] (!%p524_p9) }
  0x1c   : > { %s581_s24 = scalar_select %p580_p10, %s2414_s0, 1  ;;  %v1894_v46 = vld [vmem:[%s2755_s3] ss:$0 sm:$0xff] }
  0x1e   : > { %s1888_s25 = sshll.u32 %s581_s24, 3  ;;  %s2289_s24 = smov 104  }
  0x1f   : > { %s583_s21 = scalar_lea.vmem %s2752_s20, %s1888_s25  ;;  %s587_s27 = scalar_lea.vmem %s2753_s1, %s1888_s25 }
  0x20   : > { %v2449_v0 = vld [vmem:[%s583_s21] sm:$0xff]  ;;  %s2754_s1 = sld [smem:[#allocation12_spill]]  ;;  %s2287_s21 = smov 120  }
  0x21   : > { %v589_v1 = vld [vmem:[%s587_s27] sm:$0xff]  ;;  %v593_v2 = vsel %vm592_vm0, %v2449_v0, 0.0  ;;  %s2290_s25 = smov 88   ;;  %s2293_s20 = smov 96  }
  0x22   : > { %594 = vadd.xlane.f32.xlu0 %v593_v2  ;;  %v623_v3 = vsel %vm592_vm0, %v589_v1, 0.0  ;;  %s2296_s27 = smov 24  }
  0x26   : > { %624 = vadd.xlane.f32.xlu0 %v623_v3  ;;  %v650_v14 = vld [vmem:[%s2754_s1] sm:$0xff]  ;;  %v651_v15 = vld [vmem:[%s2754_s1 + $0x8] sm:$0xff]  ;;  %v652_v18 = vld [vmem:[%s2754_s1 + $0x10] sm:$0xff] }
  0x27   : > { %v2095_v16 = vpack.c.bf16 %v651_v15, %v650_v14  ;;  %v653_v19 = vld [vmem:[%s2754_s1 + $0x18] sm:$0xff] }
  0x28   : > { %v2098_v20 = vpack.c.bf16 %v653_v19, %v652_v18 }
  0x29   : > { %2096 = vmatpush3.bf16.msra.mxu1 %v2095_v16 }
  0x2a   : > { %2097 = vmatprep.subr.bf16.mxu1 %v2284_v17 }
  0x2d   : > { %2099 = vmatpush3.bf16.msra.mxu1 %v2098_v20 }
  0x2e   : > { %2100 = vmatprep.subr.bf16.mxu1 %v2284_v17 }
  0xaf   : > { %v595_v4 = vpop.xlane.xlu0 %594 }
  0xb0   : > { %v597_v5 = vmul.f32 0.03125, %v595_v4 }
  0xb2   : > { %v598_v6 = vsub.f32 %v2449_v0, %v597_v5 }
  0xb3   : > { %v625_v7 = vpop.xlane.xlu0 %624 }
  0xb4   : > { %v626_v8 = vmul.f32 0.03125, %v625_v7  ;;  %v599_v9 = vmul.f32 %v598_v6, %v598_v6 }
  0xb6   : > { %v627_v10 = vsub.f32 %v589_v1, %v626_v8  ;;  %v600_v11 = vsel %vm592_vm0, %v599_v9, 0.0 }
  0xb7   : > { %601 = vadd.xlane.f32.xlu1 %v600_v11 }
  0xb8   : > { %v628_v12 = vmul.f32 %v627_v10, %v627_v10 }
  0xba   : > { %v629_v13 = vsel %vm592_vm0, %v628_v12, 0.0 }
  0xbb   : > { %630 = vadd.xlane.f32.xlu1 %v629_v13 }
 0x144   : > { %v602_v22 = vpop.xlane.xlu1 %601 }
 0x145   : > { %v603_v23 = vmul.f32 0.03125, %v602_v22 }
 0x147   : > { %v604_v24 = vadd.f32 1e-05, %v603_v23 }
 0x148   : > { %v631_v25 = vpop.xlane.xlu1 %630 }
 0x149   : > { %2194 = vrsqrt.f32 %v604_v24  ;;  %v632_v26 = vmul.f32 0.03125, %v631_v25 }
 0x14b   : > { %v633_v27 = vadd.f32 1e-05, %v632_v26 }
 0x14d   : > { %2196 = vrsqrt.f32 %v633_v27 }
 0x153   : > { %v2195_v28 = vpop.eup %2194 }
 0x154   : > { %v606_v30 = vmul.f32 %v2195_v28, %v598_v6 }
 0x156   : > { %v613_v34 = vmul.f32 %v1890_v29, %v606_v30 }
 0x157   : > { %v2197_v35 = vpop.eup %2196 }
 0x158   : > { %v635_v37 = vmul.f32 %v2197_v35, %v627_v10  ;;  %v620_v38 = vadd.f32 %v1891_v33, %v613_v34 }
 0x15a   : > { %1984 = vmatmul.mubr.msk.f32.vlgmr.msra.gmra.mrb[0].mxu1 %vm592_vm0, %v620_v38  ;;  %v642_v43 = vmul.f32 %v1892_v41, %v635_v37 }
 0x15b   : > { %2102 = vmatpush3.bf16.msra.mxu1 %v2101_v36  ;;  %1994 = vmatprep.mubr.msk.f32.mxu1 %vm2285_vm1, %v2286_v21 }
 0x15c   : > { %2103 = vmatprep.subr.bf16.mxu1 %v2284_v17  ;;  %v649_v45 = vadd.f32 %v1893_v44, %v642_v43  ;;  %v1497_v43 = vld [vmem:[%s2723_s6] sm:$0xff]  ;;  %v1498_v44 = vld [vmem:[%s2723_s6 + $0x8] sm:$0xff] }
 0x15f   : > { %2105 = vmatpush3.bf16.msra.mxu1 %v2104_v42 }
 0x160   : > { %2002 = vmatprep.subr.mxu1 %v2286_v21 }
 0x162   : > { %1995 = vmatmul.mubr.msk.f32.vlgmr.msra.gmra.mrb[2].mxu1 %vm592_vm0, %v649_v45  ;;  %v2107_v45 = vpack.c.bf16 %v1498_v44, %v1497_v43  ;;  %v1713_v43 = vld [vmem:[%s2727_s10 + $0x50] sm:$0xff]  ;;  %v1714_v44 = vld [vmem:[%s2727_s10 + $0x58] sm:$0xff] }
 0x163   : > { %2004 = vmatprep.mubr.msk.f32.mxu1 %vm2285_vm1, %v2286_v21 }
 0x22d   : > { %v730_v47 = vpop.f32.mrb[0].mxu1 }
 0x22e   : > { %v731_v48 = vadd.f32 %v1894_v46, %v730_v47  ;;  %v1985_v49 = vpop.f32.mrb[1].mxu1  ;;  %v1499_v46 = vld [vmem:[%s2723_s6 + $0x10] sm:$0xff]  ;;  %v1500_v47 = vld [vmem:[%s2723_s6 + $0x18] sm:$0xff] }
 0x230   : > { %983 = vrot.lane.b32.xlu1 %v731_v48, %s2287_s21 }
 0x235   : > { %v814_v51 = vpop.f32.mrb[2].mxu1 }
 0x236   : > { %v815_v52 = vadd.f32 %v1896_v50, %v814_v51  ;;  %v1996_v53 = vpop.f32.mrb[3].mxu1  ;;  %v2110_v50 = vpack.c.bf16 %v1500_v47, %v1499_v46  ;;  %v1715_v46 = vld [vmem:[%s2727_s10 + $0x60] sm:$0xff]  ;;  %v1716_v47 = vld [vmem:[%s2727_s10 + $0x68] sm:$0xff] }
 0x238   : > { %1156 = vrot.lane.b32.xlu1 %v815_v52, %s2288_s22  ;;  %985 = vrot.lane.b32.xlu0 %v815_v52, %s2287_s21  ;;  %s2295_s21 = smov 16  }
 0x239   : > { %1998 = vmatpush3.xpose.msk.msra.mxu0 %vm818_vm2, %v815_v52 }
 0x23a   : > { %2007 = vmatprep.subr.mxu0 %v2286_v21 }
 0x23c   : > { %2000 = vmatmul.mubr.msk.f32.vlgmr.msra.gmra.mrb[0].mxu0 %vm818_vm2, %v731_v48  ;;  %1154 = vrot.lane.b32.xlu1 %v731_v48, %s2288_s22 }
 0x23d   : > { %1327 = vrot.lane.b32.xlu0 %v815_v52, %s2289_s24  ;;  %2009 = vmatprep.mubr.msk.f32.mxu0 %vm2285_vm1, %v2286_v21 }
 0x240   : > { %1325 = vrot.lane.b32.xlu1 %v731_v48, %s2289_s24 }
 0x2a2   : > { %v984_v54 = vpop.permute.xlu1 %983 }
 0x2aa   : > { %v986_v55 = vpop.permute.xlu0 %985  ;;  %v1157_v56 = vpop.permute.xlu1 %1156 }
 0x2ab   : > { %2008 = vmatpush3.xpose.msk.msra.mxu0 %vm818_vm2, %v986_v55 }
 0x2ac   : > { %2017 = vmatprep.subr.mxu0 %v2286_v21 }
 0x2ae   : > { %2010 = vmatmul.mubr.msk.f32.vlgmr.msra.gmra.mrb[2].mxu0 %vm818_vm2, %v984_v54  ;;  %v1155_v57 = vpop.permute.xlu1 %1154 }
 0x2af   : > { %2018 = vmatpush3.xpose.msk.msra.mxu0 %vm818_vm2, %v1157_v56  ;;  %2019 = vmatprep.mubr.msk.f32.mxu0 %vm2285_vm1, %v2286_v21  ;;  %v1328_v58 = vpop.permute.xlu0 %1327 }
 0x2b0   : > { %2027 = vmatprep.subr.mxu0 %v2286_v21 }
 0x2b2   : > { %2020 = vmatmul.mubr.msk.f32.vlgmr.msra.gmra.mrb[4].mxu0 %vm818_vm2, %v1155_v57  ;;  %v1326_v59 = vpop.permute.xlu1 %1325 }
 0x2b3   : > { %2028 = vmatpush3.xpose.msk.msra.mxu0 %vm818_vm2, %v1328_v58  ;;  %2029 = vmatprep.mubr.msk.f32.mxu0 %vm2285_vm1, %v2286_v21 }
 0x2b4   : > { %2118 = vmatprep.subr.bf16.mxu0 %v2284_v17 }
 0x2b6   : > { %2030 = vmatmul.mubr.msk.f32.vlgmr.msra.gmra.mrb[6].mxu0 %vm818_vm2, %v1326_v59 }
 0x2b7   : > { %2091 = vmatprep.mubr.msk.f32.mxu0 %vm2285_vm1, %v2286_v21 }
 0x30f   : > { %v891_v60 = vpop.f32.mrb[0].mxu0 }
 0x310   : > { %v2001_v61 = vpop.f32.mrb[1].mxu0  ;;  %v895_v62 = vsel %vm818_vm2, %v891_v60, -inf }
 0x311   : > { %896 = vmax.xlane.f32.xlu0 %v895_v62 }
 0x381   : > { %v1057_v63 = vpop.f32.mrb[2].mxu0 }
 0x382   : > { %v2011_v1 = vpop.f32.mrb[3].mxu0  ;;  %v1061_v2 = vsel %vm818_vm2, %v1057_v63, -inf }
 0x383   : > { %1062 = vmax.xlane.f32.xlu1 %v1061_v2  ;;  %v1910_v2 = vld [vmem:[%s2724_s7] ss:$0 sm:$0xff] }
 0x385   : > { %v1228_v3 = vpop.f32.mrb[4].mxu0 }
 0x386   : > { %v2021_v4 = vpop.f32.mrb[5].mxu0  ;;  %v1232_v5 = vsel %vm818_vm2, %v1228_v3, -inf }
 0x387   : > { %1233 = vmax.xlane.f32.xlu0 %v1232_v5 }
 0x389   : > { %v1399_v6 = vpop.f32.mrb[6].mxu0 }
 0x38a   : > { %v2031_v7 = vpop.f32.mrb[7].mxu0  ;;  %v1403_v8 = vsel %vm818_vm2, %v1399_v6, -inf }
 0x38b   : > { %1404 = vmax.xlane.f32.xlu0 %v1403_v8 }
 0x394   : > { %1071 = vrot.lane.b32.xlu1 %v815_v52, %s2290_s25  ;;  %s577_s25 = sand.u32 1, %s2274_s28  }
 0x398   : > { %1242 = vrot.lane.b32.xlu1 %v815_v52, %s2291_s26  ;;  %s1887_s26 = sshll.u32 %s577_s25, 3 }
 0x39c   : > { %1413 = vrot.lane.b32.xlu1 %v815_v52, %s2292_s19  ;;  %s1799_s19 = scalar_lea.sflag [#allocation4], %s577_s25 }
 0x39e   : > { %v897_v9 = vpop.xlane.xlu0 %896 }
 0x39f   : > { %v898_v10 = vsub.f32 %v891_v60, %v897_v9 }
 0x3a1   : > { %905 = vrot.lane.b32.xlu0 %v815_v52, %s2293_s20  ;;  %v899_v11 = vmul.f32 1.442695, %v898_v10  ;;  %s2294_s20 = smov 8  }
 0x3a3   : > { %2198 = vpow2.f32 %v899_v11 }
 0x3ad   : > { %v2199_v25 = vpop.eup %2198 }
 0x3ae   : > { %v901_v34 = vsel %vm818_vm2, %v2199_v25, 0.0 }
 0x410   : > { %v1063_v12 = vpop.xlane.xlu1 %1062 }
 0x411   : > { %v1064_v13 = vsub.f32 %v1057_v63, %v1063_v12  ;;  %v1611_v12 = vld [vmem:[%s2725_s8] sm:$0xff] }
 0x413   : > { %v1065_v14 = vmul.f32 1.442695, %v1064_v13 }
 0x414   : > { %v1234_v15 = vpop.xlane.xlu0 %1233  ;;  %v1072_v22 = vpop.permute.xlu1 %1071 }
 0x415   : > { %2200 = vpow2.f32 %v1065_v14  ;;  %v1235_v16 = vsub.f32 %v1228_v3, %v1234_v15  ;;  %v1613_v14 = vld [vmem:[%s2725_s8 + $0x10] sm:$0xff]  ;;  %v1614_v15 = vld [vmem:[%s2725_s8 + $0x18] sm:$0xff] }
 0x417   : > { %v1236_v18 = vmul.f32 1.442695, %v1235_v16  ;;  %v2116_v16 = vpack.c.bf16 %v1614_v15, %v1613_v14 }
 0x418   : > { %v1405_v19 = vpop.xlane.xlu0 %1404  ;;  %v1243_v27 = vpop.permute.xlu1 %1242 }
 0x419   : > { %2202 = vpow2.f32 %v1236_v18  ;;  %v1406_v20 = vsub.f32 %v1399_v6, %v1405_v19 }
 0x41b   : > { %v1407_v23 = vmul.f32 1.442695, %v1406_v20 }
 0x41c   : > { %v906_v24 = vpop.permute.xlu0 %905  ;;  %v1414_v31 = vpop.permute.xlu1 %1413 }
 0x41d   : > { %2204 = vpow2.f32 %v1407_v23  ;;  %2003 = vmatpush3.msra.mxu1 %v906_v24  ;;  %v1912_v23 = vld [vmem:[%s2731_s14] ss:$0 sm:$0xff] }
 0x41e   : > { %2005 = vmatmul.mubr.msk.f32.vlgmr.msra.gmra.mrb[4].mxu1 %vm818_vm2, %v2199_v25  ;;  %2012 = vmatprep.subr.mxu1 %v2286_v21  ;;  %v1913_v25 = vld [vmem:[%s2732_s15] ss:$0 sm:$0xff] }
 0x41f   : > { %v2201_v26 = vpop.eup %2200  ;;  %2013 = vmatpush3.msra.mxu1 %v1072_v22  ;;  %2014 = vmatprep.mubr.msk.f32.mxu1 %vm2285_vm1, %v2286_v21 }
 0x420   : > { %v1067_v28 = vsel %vm818_vm2, %v2201_v26, 0.0  ;;  %2022 = vmatprep.subr.mxu1 %v2286_v21 }
 0x421   : > { %1068 = vadd.xlane.f32.xlu0 %v1067_v28  ;;  %v1703_v28 = vld [vmem:[%s2727_s10] sm:$0xff] }
 0x422   : > { %2015 = vmatmul.mubr.msk.f32.vlgmr.msra.gmra.mrb[6].mxu1 %vm818_vm2, %v2201_v26 }
 0x423   : > { %v2203_v29 = vpop.eup %2202  ;;  %2023 = vmatpush3.msra.mxu1 %v1243_v27  ;;  %2024 = vmatprep.mubr.msk.f32.mxu1 %vm2285_vm1, %v2286_v21 }
 0x424   : > { %v1238_v30 = vsel %vm818_vm2, %v2203_v29, 0.0  ;;  %2032 = vmatprep.subr.mxu1 %v2286_v21 }
 0x425   : > { %1239 = vadd.xlane.f32.xlu1 %v1238_v30 }
 0x426   : > { %2025 = vmatmul.mubr.msk.f32.vlgmr.msra.gmra.mrb[8].mxu1 %vm818_vm2, %v2203_v29  ;;  %v1704_v29 = vld [vmem:[%s2727_s10 + $0x8] sm:$0xff] }
 0x427   : > { %v2205_v32 = vpop.eup %2204  ;;  %2033 = vmatpush3.msra.mxu1 %v1414_v31  ;;  %2034 = vmatprep.mubr.msk.f32.mxu1 %vm2285_vm1, %v2286_v21  ;;  %v2119_v30 = vpack.c.bf16 %v1704_v29, %v1703_v28  ;;  %v1705_v31 = vld [vmem:[%s2727_s10 + $0x10] sm:$0xff] }
 0x428   : > { %v1409_v33 = vsel %vm818_vm2, %v2205_v32, 0.0  ;;  %2106 = vmatprep.subr.bf16.mxu1 %v2284_v17 }
 0x429   : > { %1410 = vadd.xlane.f32.xlu0 %v1409_v33  ;;  %2120 = vmatpush3.bf16.msra.mxu0 %v2119_v30 }
 0x42a   : > { %2035 = vmatmul.mubr.msk.f32.vlgmr.msra.gmra.mrb[10].mxu1 %vm818_vm2, %v2205_v32  ;;  %2121 = vmatprep.subr.bf16.mxu0 %v2284_v17  ;;  %v1706_v32 = vld [vmem:[%s2727_s10 + $0x18] sm:$0xff] }
 0x42b   : > { %2045 = vmatprep.mubr.msk.f32.mxu1 %vm2285_vm1, %v2286_v21  ;;  %2108 = vmatpush3.bf16.msra.mxu1 %v2107_v45  ;;  %v2122_v33 = vpack.c.bf16 %v1706_v32, %v1705_v31  ;;  %v2134_v45 = vpack.c.bf16 %v1714_v44, %v1713_v43 }
 0x42c   : > { %2109 = vmatprep.subr.bf16.mxu1 %v2284_v17 }
 0x42d   : > { %902 = vadd.xlane.f32.xlu0 %v901_v34  ;;  %2123 = vmatpush3.bf16.msra.mxu0 %v2122_v33  ;;  %v1707_v34 = vld [vmem:[%s2727_s10 + $0x20] sm:$0xff] }
 0x42e   : > { %2124 = vmatprep.subr.bf16.mxu0 %v2284_v17 }
 0x42f   : > { %2111 = vmatpush3.bf16.msra.mxu1 %v2110_v50  ;;  %v1718_v50 = vld [vmem:[%s2727_s10 + $0x78] sm:$0xff] }
 0x430   : > { %2112 = vmatprep.subr.bf16.mxu1 %v2284_v17 }
 0x4ae   : > { %v1069_v35 = vpop.xlane.xlu0 %1068 }
 0x4b2   : > { %v1240_v38 = vpop.xlane.xlu1 %1239 }
 0x4b6   : > { %v1411_v36 = vpop.xlane.xlu0 %1410 }
 0x4ba   : > { %v903_v37 = vpop.xlane.xlu0 %902 }
 0x4bb   : > { %2206 = vrcp.f32 %v903_v37  ;;  %v1709_v37 = vld [vmem:[%s2727_s10 + $0x30] sm:$0xff] }
 0x4bc   : > { %2208 = vrcp.f32 %v1069_v35  ;;  %v1708_v35 = vld [vmem:[%s2727_s10 + $0x28] sm:$0xff] }
 0x4bd   : > { %2210 = vrcp.f32 %v1240_v38  ;;  %v1710_v38 = vld [vmem:[%s2727_s10 + $0x38] sm:$0xff] }
 0x4be   : > { %2212 = vrcp.f32 %v1411_v36  ;;  %v2125_v36 = vpack.c.bf16 %v1708_v35, %v1707_v34 }
 0x4c0   : > { %2126 = vmatpush3.bf16.msra.mxu0 %v2125_v36 }
 0x4c1   : > { %2127 = vmatprep.subr.bf16.mxu0 %v2284_v17 }
 0x4c5   : > { %v2207_v39 = vpop.eup %2206 }
 0x4c6   : > { %v2209_v48 = vpop.eup %2208 }
 0x4c7   : > { %v2211_v53 = vpop.eup %2210 }
 0x4c8   : > { %v2213_v57 = vpop.eup %2212 }
 0x4f1   : > { %v977_v40 = vpop.f32.mrb[4].mxu1 }
 0x4f2   : > { %v981_v41 = vmul.f32 %v2207_v39, %v977_v40  ;;  %v2006_v42 = vpop.f32.mrb[5].mxu1  ;;  %v2128_v39 = vpack.c.bf16 %v1710_v38, %v1709_v37  ;;  %v1711_v40 = vld [vmem:[%s2727_s10 + $0x40] sm:$0xff] }
 0x4f4   : > { %982 = vst.msk [vmem:[#allocation2] sm:$0xff] %vm818_vm2, %v981_v41  ;;  %2129 = vmatpush3.bf16.msra.mxu0 %v2128_v39  ;;  %v1712_v41 = vld [vmem:[%s2727_s10 + $0x48] sm:$0xff] }
 0x4f5   : > { %v1143_v49 = vpop.f32.mrb[6].mxu1  ;;  %2130 = vmatprep.subr.bf16.mxu0 %v2284_v17  ;;  %v2131_v42 = vpack.c.bf16 %v1712_v41, %v1711_v40 }
 0x4f6   : > { %v1147_v51 = vmul.f32 %v2209_v48, %v1143_v49  ;;  %v2016_v52 = vpop.f32.mrb[7].mxu1  ;;  %v2137_v48 = vpack.c.bf16 %v1716_v47, %v1715_v46  ;;  %v1717_v49 = vld [vmem:[%s2727_s10 + $0x70] sm:$0xff] }
 0x4f7   : > { %v1914_v52 = vld [vmem:[%s2726_s9] ss:$0 sm:$0xff] }
 0x4f8   : > { %1149 = vrot.lane.b32.xlu0 %v1147_v51, %s2294_s20  ;;  %2132 = vmatpush3.bf16.msra.mxu0 %v2131_v42  ;;  %v2140_v51 = vpack.c.bf16 %v1718_v50, %v1717_v49 }
 0x4f9   : > { %v1314_v54 = vpop.f32.mrb[8].mxu1  ;;  %2133 = vmatprep.subr.bf16.mxu0 %v2284_v17 }
 0x4fa   : > { %v1318_v55 = vmul.f32 %v2211_v53, %v1314_v54  ;;  %v2026_v56 = vpop.f32.mrb[9].mxu1 }
 0x4fc   : > { %1320 = vrot.lane.b32.xlu1 %v1318_v55, %s2295_s21  ;;  %2135 = vmatpush3.bf16.msra.mxu0 %v2134_v45  ;;  %s1919_s21 = sshll.u32 %s2414_s0, 7 }
 0x4fd   : > { %v1485_v58 = vpop.f32.mrb[10].mxu1  ;;  %2136 = vmatprep.subr.bf16.mxu0 %v2284_v17  ;;  %s2674_s1 = scalar_lea.hbm %s2735_s18, %s1919_s21 }
 0x4fe   : > { %v1489_v59 = vmul.f32 %v2213_v57, %v1485_v58  ;;  %v2036_v60 = vpop.f32.mrb[11].mxu1 }
 0x500   : > { %1491 = vrot.lane.b32.xlu1 %v1489_v59, %s2296_s27  ;;  %2138 = vmatpush3.bf16.msra.mxu0 %v2137_v48  ;;  %s579_s27 = scalar_lea.vmem [#allocation3], %s1887_s26  ;;  %s2297_s26 = smov [#allocation3]  }
 0x501   : > { %2139 = vmatprep.subr.bf16.mxu0 %v2284_v17  ;;  %s1812_s29 = sshll.u32 %s579_s27, 4  ;;  %s2224_s20 = sshll.u32 %s2297_s26, 4  ;;  %s2676_s29 = int_to_ptr.vmem [resolvable:$true] %s1812_s29  ;;  %s2225_s20 = int_to_ptr.vmem [resolvable:$false] %s2224_s20 }
 0x502   : > { %s2220_s0 = scalar_lea.vmem %s2676_s29, 128  ;;  %s2226_s3 = scalar_lea.vmem %s2225_s20, 256 }
 0x503   : > { %p2221_p11 = scmp.ne.s32.totalorder %s2676_s29, %s2220_s0  ;;  %p2227_p0 = scmp.lt.s32.totalorder %s2676_s29, %s2225_s20 }
 0x504   : > { %2141 = vmatpush3.bf16.msra.mxu0 %v2140_v51  ;;  %p2228_p1 = scmp.lt.s32.totalorder %s2226_s3, %s2220_s0 }
 0x505   : > { %p2222_p12 = pnand %p2221_p11, %p2431_p5 }
 0x506   : > { %p2229_p2 = por %p2228_p1, %p2227_p0 }
 0x507   : > { %p2223_p13 = pneg %p2222_p12 }
 0x509   : > { %p2230_p3 = pnand %p2229_p2, %p2223_p13 }
 0x56a   : > { %v1150_v61 = vpop.permute.xlu0 %1149 }
 0x56b   : > { %1153 = vst.msk [vmem:[#allocation2] sm:$0xff] %vm1152_vm3, %v1150_v61  ;;  %v1917_v61 = vld [vmem:[%s2728_s11] ss:$0 sm:$0xff] }
 0x56e   : > { %v1321_v62 = vpop.permute.xlu1 %1320 }
 0x56f   : > { %1324 = vst.msk [vmem:[#allocation2] sm:$0xff] %vm1323_vm4, %v1321_v62 }
 0x572   : > { %v1492_v63 = vpop.permute.xlu1 %1491 }
 0x573   : > { %1495 = vst.msk [vmem:[#allocation2] sm:$0xff] %vm1494_vm5, %v1492_v63 }
 0x57a   : > { %v1496_v1 = vld [vmem:[#allocation2] sm:$0xff] }
 0x57b   : > { %2046 = vmatmul.mubr.msk.f32.vlgmr.msra.gmra.mrb[12].mxu1 %vm592_vm0, %v1496_v1 }
 0x57c   : > { %2056 = vmatprep.mubr.msk.f32.mxu1 %vm2285_vm1, %v2286_v21 }
 0x64e   : > { %v1577_v3 = vpop.f32.mrb[12].mxu1 }
 0x64f   : > { %v1578_v4 = vadd.f32 %v1910_v2, %v1577_v3  ;;  %v2047_v5 = vpop.f32.mrb[13].mxu1 }
 0x651   : > { %v2581_v6 = vadd.f32 %v1578_v4, %v2449_v0  ;;  %v1612_v0 = vld [vmem:[%s2725_s8 + $0x8] sm:$0xff] }
 0x652   : > { %v2113_v13 = vpack.c.bf16 %v1612_v0, %v1611_v12 }
 0x653   : > { %v1584_v7 = vsel %vm592_vm0, %v2581_v6, 0.0 }
 0x654   : > { %1585 = vadd.xlane.f32.xlu1 %v1584_v7  ;;  %2114 = vmatpush3.bf16.msra.mxu1 %v2113_v13 }
 0x655   : > { %2115 = vmatprep.subr.bf16.mxu1 %v2284_v17 }
 0x658   : > { %2117 = vmatpush3.bf16.msra.mxu1 %v2116_v16 }
 0x6e1   : > { %v1586_v8 = vpop.xlane.xlu1 %1585 }
 0x6e2   : > { %v1587_v9 = vmul.f32 0.03125, %v1586_v8 }
 0x6e4   : > { %v1588_v10 = vsub.f32 %v2581_v6, %v1587_v9 }
 0x6e6   : > { %v1589_v11 = vmul.f32 %v1588_v10, %v1588_v10 }
 0x6e8   : > { %v1590_v21 = vsel %vm592_vm0, %v1589_v11, 0.0 }
 0x6e9   : > { %1591 = vadd.xlane.f32.xlu0 %v1590_v21 }
 0x776   : > { %v1592_v18 = vpop.xlane.xlu0 %1591 }
 0x777   : > { %v1593_v19 = vmul.f32 0.03125, %v1592_v18 }
 0x779   : > { %v1594_v20 = vadd.f32 1e-05, %v1593_v19 }
 0x77b   : > { %2214 = vrsqrt.f32 %v1594_v20 }
 0x785   : > { %v2215_v22 = vpop.eup %2214 }
 0x786   : > { %v1596_v24 = vmul.f32 %v2215_v22, %v1588_v10 }
 0x788   : > { %v1603_v26 = vmul.f32 %v1912_v23, %v1596_v24 }
 0x78a   : > { %v1610_v27 = vadd.f32 %v1913_v25, %v1603_v26 }
 0x78c   : > { %2057 = vmatmul.mubr.msk.f32.vlgmr.msra.gmra.mrb[14].mxu1 %vm592_vm0, %v1610_v27 }
 0x85f   : > { %v1691_v53 = vpop.f32.mrb[14].mxu1 }
 0x860   : > { %v1692_v54 = vadd.f32 %v1914_v52, %v1691_v53  ;;  %v2058_v55 = vpop.f32.mrb[15].mxu1 }
 0x862   : > { %v1916_v17 = vmul.f32 -1.702, %v1692_v54 }
 0x864   : > { %v1697_v56 = vmul.f32 1.442695, %v1916_v17 }
 0x866   : > { %2216 = vpow2.f32 %v1697_v56 }
 0x870   : > { %v2217_v57 = vpop.eup %2216 }
 0x871   : > { %v1699_v58 = vadd.f32 1.0, %v2217_v57 }
 0x873   : > { %2218 = vrcp.f32 %v1699_v58 }
 0x87d   : > { %v2219_v59 = vpop.eup %2218 }
 0x87e   : > { %v1702_v60 = vmul.f32 %v2219_v59, %v1692_v54 }
 0x880   : > { %2092 = vmatmul.mubr.f32.vlgmr.msra.gmra.mrb[8].mxu0 %v1702_v60 }
 0x953   : > { %v1792_v62 = vpop.f32.mrb[8].mxu0 }
 0x954   : > { %v1793_v63 = vadd.f32 %v1917_v61, %v1792_v62  ;;  %v2093_v1 = vpop.f32.mrb[9].mxu0 }
 0x956   : > { %v1796_v2 = vadd.f32 %v1793_v63, %v2581_v6 }
 0x958   : > { %1797 = vst.msk [vmem:[%s579_s27] sm:$0xff] %vm592_vm0, %v1796_v2 }
 0x959   : > { %2233 = shalt.err (!%p2230_p3)
}
 0x95a   : > { %s2234_s25 = scalar_lea.hbm %s2674_s1, 128  ;;  %s2238_s22 = scalar_lea.hbm %s2735_s18, 256 }
 0x95b   : > { %p2235_p4 = scmp.ne.s32.totalorder %s2674_s1, %s2234_s25  ;;  %p2239_p9 = scmp.lt.u32.totalorder %s2674_s1, %s2735_s18 }
 0x95c   : > { %p2240_p10 = scmp.lt.u32.totalorder %s2238_s22, %s2234_s25  ;;  %p2242_p12 = scmp.lt.u32.totalorder %s2234_s25, %s2674_s1 }
 0x95d   : > { %p2236_p7 = pnand %p2235_p4, %p2431_p5 }
 0x95e   : > { %p2241_p11 = por %p2240_p10, %p2239_p9 }
 0x95f   : > { %p2237_p8 = pneg %p2236_p7 }
 0x960   : > { %p2243_p13 = por %p2242_p12, %p2241_p11 }
 0x962   : > { %p2244_p0 = pnand %p2243_p13, %p2237_p8 }
 0x964   : > { %2247 = shalt.err (!%p2244_p0)
}
 0x965   : > { %2142 = dma.vmem_to_hbm [thread:$0]  (%p2431_p5), %s2676_s29, 128, %s2674_s1, %s1799_s19  }
 0x966 PF: > { %s2756_s3 = sld [smem:[#allocation6_spill]]  ;;  %p2148_p1 = scmp.ge.s32.totalorder %s2282_s30, 2 }
 0x968   : > { %p2145_p2 = pnand %p2148_p1, %p2435_p6 }
 0x96c   : > { %s1824_s0 = sand.u32 1, %s2756_s3  }
 0x96d   : > { %s1825_s20 = scalar_lea.sflag [#allocation4], %s1824_s0 }
 0x96e   : > { %2265 = dma.done.wait (!%p2145_p2), %s1825_s20, 128  }
 0x96f   : > { %2267 = vsyncadd (!%p2145_p2), %s1825_s20, 4294967168  ;;  %s2757_s30 = sld [smem:[#allocation8_spill]]  ;;  %s2758_s25 = sld [smem:[#allocation7_spill]] }
 0x970   : > { %s2759_s29 = sld [smem:[#allocation9_spill]]  ;;  %s2760_s27 = smov %s2274_s28 }
 0x975   : > { %p28_p3 = scmp.ge.s32.totalorder %s2757_s30, 4   ;;  %s2761_s28 = smov %s2758_s25 }
 0x977   :  { %30 = sbr.rel (!%p28_p3) target bundleno = 8 (0x8), region = 130 }
 0x97e   :  { %1830 = vsyncpa [#allocation4], 1 }
 0x97f   :  { %1832 = vsyncpa [#allocation4 + $0x1], 1 }

</bundles_post_ra>
